<compile_context>
chip_gen: v7x
topology: tpu7x:2x2x1
jax: 0.10.0
libtpu: 0.0.40
codegen_flags: <defaults>
</compile_context>

<pallas_src>
import jax
import jax.numpy as jnp
from jax.experimental import pallas as pl
from jax.experimental.pallas import tpu as pltpu


def _head_kernel(x_ref, wa_ref, wf_ref, bf_ref, o_ref):
    # x_ref: (TB, S, D) tile of batch rows, kept in its native dtype.
    x = x_ref[...]                                            # (TB, S, D)
    TB, S, D = x.shape

    # Attention scores via VPU multiply + lane (last-dim) reduce.  Only the
    # small (TB, S) result is upcast to f32.
    # NOTE: if D < 128 the lane axis is under-occupied; this path is still
    # DMA-bound for the shapes we target, so no lane-folding is done here.
    wa = wa_ref[...].reshape(1, 1, D).astype(x.dtype)         # (1, 1, D)
    scores = jnp.sum(x * wa, axis=-1).astype(jnp.float32)     # (TB, S)
    # b_att is omitted on purpose: a scalar bias added uniformly before a
    # softmax over the sequence axis cannot change the output.

    # Softmax over the sequence axis in f32 with an EXACT divide (the approx
    # reciprocal previously broke 1e-4 parity with the reference).
    m = jnp.max(scores, axis=-1, keepdims=True)               # (TB, 1)
    e = jnp.exp(scores - m)                                   # (TB, S)
    attn = e / jnp.sum(e, axis=-1, keepdims=True)             # (TB, S) f32

    # Weighted sum over the sequence (sublane reduce).  The dominant
    # (TB, S, D) multiply stays in x's dtype (bf16 VALU on v6e/v7x).
    pooled = jnp.sum(x * attn.astype(x.dtype)[:, :, None], axis=1)   # (TB, D)

    # Final projection on the MXU: operands in the weight dtype, f32 accumulate.
    wf = wf_ref[...]                                          # (D, C_pad)
    out = jnp.dot(pooled.astype(wf.dtype), wf,
                  preferred_element_type=jnp.float32)         # (TB, C_pad)
    out = out + bf_ref[...].astype(jnp.float32)               # (1, C_pad) bcast

    o_ref[...] = out.astype(o_ref.dtype)


def _vmem_limit_and_budget_bytes():
    """(vmem_limit_bytes, per-kernel working-set budget) for this chip."""
    try:
        cap = int(pltpu.get_tpu_info().vmem_capacity_bytes)
    except Exception:
        cap = 64 * 1024 * 1024        # conservative fallback (v7x physical VMEM)
    # ~75% of physical for the scoped limit (96 MiB on v5e/v6e, 48 MiB on v7x),
    # ~60% as the budget we actually size tiles against (headroom for Mosaic
    # internal scratch and the small weight/output buffers).
    return int(cap * 0.75), int(cap * 0.60)


def _pick_batch_tile(B, S, D, x_itemsize, budget_bytes):
    """Largest batch tile whose *real* VMEM footprint fits the budget."""
    # Per batch row, live VMEM is roughly:
    #   * double-buffered input slab:            2 * S * D * itemsize
    #   * the two (S, D) elementwise products
    #     (x*wa and x*attn), in x's dtype:        2 * S * D * itemsize
    #   * (S,)-sized score/exp rows, (D,) pooled: negligible
    per_row = 4 * S * D * x_itemsize + 256
    tb = max(1, budget_bytes // per_row)
    tb = min(tb, B)
    # Keep >= ~4 grid steps for pipelining and v7x dual-TensorCore sharding
    # when the batch is large enough, but never below an 8-row sublane tile.
    if B >= 32:
        tb = min(tb, max(8, -(-B // 4)))
    if tb >= 8:
        tb = (tb // 8) * 8            # sublane-friendly tile height
    return int(max(1, tb))


def attention_classification_head(x, w_att, b_att, w_fc, b_fc, *, block_b=None):
    """x: (B, S, D); w_att: (D, 1); b_att: (1, 1); w_fc: (D, C); b_fc: (1, C)."""
    assert b_att.size == 1, (
        "b_att must be a scalar: it is dropped inside the kernel because a "
        "uniform bias before a softmax over the sequence axis is a no-op.")
    B, S, D = x.shape
    C = w_fc.shape[1]

    w_att_row = w_att.reshape(1, D)                 # (1, D) lane-major vector

    # Lane-dense output: pad the class dim to a multiple of 128 with zeros so
    # every output store is a full, unmasked (TB, C_pad) slab.
    C_pad = max(128, -(-C // 128) * 128)
    w_fc_p = jnp.zeros((D, C_pad), dtype=w_fc.dtype).at[:, :C].set(w_fc)
    b_fc_p = jnp.zeros((1, C_pad), dtype=b_fc.dtype).at[:, :C].set(b_fc.reshape(1, C))

    vmem_limit, vmem_budget = _vmem_limit_and_budget_bytes()
    TB = block_b if block_b is not None else _pick_batch_tile(
        B, S, D, x.dtype.itemsize, vmem_budget)
    TB = max(1, min(TB, B))
    grid = (pl.cdiv(B, TB),)

    out_padded = pl.pallas_call(
        _head_kernel,
        out_shape=jax.ShapeDtypeStruct((B, C_pad), x.dtype),
        grid_spec=pltpu.PrefetchScalarGridSpec(
            num_scalar_prefetch=0,
            grid=grid,
            in_specs=[
                pl.BlockSpec((TB, S, D), lambda b: (b, 0, 0)),
                pl.BlockSpec((1, D), lambda b: (0, 0)),
                pl.BlockSpec((D, C_pad), lambda b: (0, 0)),
                pl.BlockSpec((1, C_pad), lambda b: (0, 0)),
            ],
            out_specs=pl.BlockSpec((TB, C_pad), lambda b: (b, 0)),
        ),
        compiler_params=pltpu.CompilerParams(
            dimension_semantics=("parallel",),   # v7x shards batch tiles over 2 TCs
            vmem_limit_bytes=vmem_limit,
        ),
    )(x, w_att_row, w_fc_p, b_fc_p)

    return out_padded[:, :C]


if __name__ == "__main__":
    # Small shapes consistent with the module: batch=2, seq=8, hidden=32, classes=4
    B, S, D, C = 2, 8, 32, 4

    key = jax.random.PRNGKey(0)
    k_x, k_wa, k_ba, k_wf, k_bf = jax.random.split(key, 5)

    x = jax.random.normal(k_x, (B, S, D), dtype=jnp.float32)

    # Deterministic parameter init (PyTorch Linear weights, stored transposed).
    w_att = jax.random.normal(k_wa, (D, 1), dtype=jnp.float32) * 0.1
    b_att = jax.random.normal(k_ba, (1, 1), dtype=jnp.float32) * 0.1
    w_fc = jax.random.normal(k_wf, (D, C), dtype=jnp.float32) * 0.1
    b_fc = jax.random.normal(k_bf, (1, C), dtype=jnp.float32) * 0.1

    out = attention_classification_head(x, w_att, b_att, w_fc, b_fc)
    out = jax.block_until_ready(out)

    # Pure-JAX reference (includes b_att; softmax shift-invariance => identical).
    scores = jnp.einsum("bsd,do->bso", x, w_att) + b_att[0, 0]
    attn = jax.nn.softmax(scores, axis=1)
    pooled = jnp.sum(x * attn, axis=1)
    ref = pooled @ w_fc + b_fc

    assert out.shape == (B, C)
    assert jnp.allclose(out, ref, atol=1e-4, rtol=1e-4), (
        f"max abs err {jnp.max(jnp.abs(out - ref))}")

    print("KERNEL_OK")
</pallas_src>

<mosaic_0001>
module attributes {stable_mosaic.version = 11 : i64} {
  func.func @_head_kernel(%arg0: i32, %arg1: memref<2x8x32xf32, #tpu.memory_space<vmem>>, %arg2: memref<1x32xf32, #tpu.memory_space<vmem>>, %arg3: memref<32x128xf32, #tpu.memory_space<vmem>>, %arg4: memref<1x128xf32, #tpu.memory_space<vmem>>, %arg5: memref<2x128xf32, #tpu.memory_space<vmem>>) attributes {dimension_semantics = [#tpu.dimension_semantics<parallel>], iteration_bounds = array<i64: 1>, scalar_prefetch = 0 : i64, scratch_operands = 0 : i64, tpu.core_type = #tpu.core_type<tc>, window_params = [{transform_indices = @transform_0, window_bounds = array<i64: 2, 8, 32>}, {pipeline_mode = #tpu.pipeline_mode<synchronous>, transform_indices = @transform_1, window_bounds = array<i64: 1, 32>}, {pipeline_mode = #tpu.pipeline_mode<synchronous>, transform_indices = @transform_2, window_bounds = array<i64: 32, 128>}, {pipeline_mode = #tpu.pipeline_mode<synchronous>, transform_indices = @transform_3, window_bounds = array<i64: 1, 128>}, {transform_indices = @transform_4, window_bounds = array<i64: 2, 128>}]} {
    %c0 = arith.constant 0 : index
    %c0_0 = arith.constant 0 : index
    %c0_1 = arith.constant 0 : index
    %0 = vector.load %arg1[%c0, %c0_0, %c0_1] : memref<2x8x32xf32, #tpu.memory_space<vmem>>, vector<2x8x32xf32>
    %c0_2 = arith.constant 0 : index
    %c0_3 = arith.constant 0 : index
    %1 = vector.load %arg2[%c0_2, %c0_3] : memref<1x32xf32, #tpu.memory_space<vmem>>, vector<1x32xf32>
    %2 = vector.shape_cast %1 : vector<1x32xf32> to vector<1x1x32xf32>
    %3 = vector.broadcast %2 : vector<1x1x32xf32> to vector<2x8x32xf32>
    %4 = arith.mulf %0, %3 : vector<2x8x32xf32>
    %cst = arith.constant dense<0.000000e+00> : vector<2x8xf32>
    %5 = vector.multi_reduction <add>, %4, %cst [2] : vector<2x8x32xf32> to vector<2x8xf32>
    %cst_4 = arith.constant dense<0xFF800000> : vector<2xf32>
    %6 = vector.multi_reduction <maximumf>, %5, %cst_4 [1] : vector<2x8xf32> to vector<2xf32>
    %7 = vector.shape_cast %6 : vector<2xf32> to vector<2x1xf32>
    %8 = vector.broadcast %7 : vector<2x1xf32> to vector<2x8xf32>
    %9 = arith.subf %5, %8 : vector<2x8xf32>
    %10 = math.exp %9 : vector<2x8xf32>
    %cst_5 = arith.constant dense<0.000000e+00> : vector<2xf32>
    %11 = vector.multi_reduction <add>, %10, %cst_5 [1] : vector<2x8xf32> to vector<2xf32>
    %12 = vector.shape_cast %11 : vector<2xf32> to vector<2x1xf32>
    %13 = vector.broadcast %12 : vector<2x1xf32> to vector<2x8xf32>
    %14 = arith.divf %10, %13 : vector<2x8xf32>
    %15 = vector.shape_cast %14 : vector<2x8xf32> to vector<2x8x1xf32>
    %16 = vector.broadcast %15 : vector<2x8x1xf32> to vector<2x8x32xf32>
    %17 = arith.mulf %0, %16 : vector<2x8x32xf32>
    %cst_6 = arith.constant dense<0.000000e+00> : vector<2x32xf32>
    %18 = vector.multi_reduction <add>, %17, %cst_6 [1] : vector<2x8x32xf32> to vector<2x32xf32>
    %c0_7 = arith.constant 0 : index
    %c0_8 = arith.constant 0 : index
    %19 = vector.load %arg3[%c0_7, %c0_8] : memref<32x128xf32, #tpu.memory_space<vmem>>, vector<32x128xf32>
    %cst_9 = arith.constant dense<0.000000e+00> : vector<2x128xf32>
    %20 = tpu.matmul %18, %19, %cst_9 {dimension_numbers = #tpu.dot_dimension_numbers<[1], [0], [0], [1], [0, 0, 1, 1], [], []>} : vector<2x32xf32>, vector<32x128xf32>, vector<2x128xf32> -> vector<2x128xf32>
    %c0_10 = arith.constant 0 : index
    %c0_11 = arith.constant 0 : index
    %21 = vector.load %arg4[%c0_10, %c0_11] : memref<1x128xf32, #tpu.memory_space<vmem>>, vector<1x128xf32>
    %22 = vector.broadcast %21 : vector<1x128xf32> to vector<2x128xf32>
    %23 = arith.addf %20, %22 : vector<2x128xf32>
    %c0_12 = arith.constant 0 : index
    %c0_13 = arith.constant 0 : index
    %24 = vector.load %arg5[%c0_12, %c0_13] : memref<2x128xf32, #tpu.memory_space<vmem>>, vector<2x128xf32>
    tpu.vector_store %arg5[%c0_12, %c0_13], %23 {strides = array<i32>} : memref<2x128xf32, #tpu.memory_space<vmem>>, vector<2x128xf32>,
    return
  }
  func.func @transform_0(%arg0: i32) -> (i32, i32, i32) {
    %c0_i32 = arith.constant 0 : i32
    %c0_i32_0 = arith.constant 0 : i32
    %c0_i32_1 = arith.constant 0 : i32
    return %arg0, %c0_i32, %c0_i32_0 : i32, i32, i32
  }
  func.func @transform_1(%arg0: i32) -> (i32, i32) {
    %c0_i32 = arith.constant 0 : i32
    %c0_i32_0 = arith.constant 0 : i32
    %c0_i32_1 = arith.constant 0 : i32
    return %c0_i32, %c0_i32_0 : i32, i32
  }
  func.func @transform_2(%arg0: i32) -> (i32, i32) {
    %c0_i32 = arith.constant 0 : i32
    %c0_i32_0 = arith.constant 0 : i32
    %c0_i32_1 = arith.constant 0 : i32
    return %c0_i32, %c0_i32_0 : i32, i32
  }
  func.func @transform_3(%arg0: i32) -> (i32, i32) {
    %c0_i32 = arith.constant 0 : i32
    %c0_i32_0 = arith.constant 0 : i32
    %c0_i32_1 = arith.constant 0 : i32
    return %c0_i32, %c0_i32_0 : i32, i32
  }
  func.func @transform_4(%arg0: i32) -> (i32, i32) {
    %c0_i32 = arith.constant 0 : i32
    %c0_i32_0 = arith.constant 0 : i32
    return %arg0, %c0_i32 : i32, i32
  }
}

</mosaic_0001>

<bundles_post_ra>
// kernel: tpu_custom_call.1
= control target key start
LH: loop header
LB: loop body
LE: loop exit
PB: predicated region body
PF: predicated region fallthrough
CT: control target
= control target key end

     0   :  { %9 = vsyncpa [#allocation3], 0  ;;  %s475_s0 = inlined_call_operand.hbm [shape: f32[2,8,32], index: 0, kind: input, shape index: {}]   ;;  %s476_s1 = inlined_call_operand.vmem [shape: f32[1,32], index: 1, kind: input, shape index: {}]   ;;  %s477_s2 = inlined_call_operand.hbm [shape: f32[32,128], index: 2, kind: input, shape index: {}]   ;;  %s478_s3 = inlined_call_operand.vmem [shape: f32[1,128], index: 3, kind: input, shape index: {}]   ;;  %s479_s4 = inlined_call_operand.hbm [shape: f32[2,128], index: 4, kind: output, shape index: {}]  }
   0x1   :  { %10 = vsyncpa [#allocation6], 0 }
   0x2   :  { %11 = vsyncpa [#allocation4], 0  ;;  %s381_s15 = smov [#allocation2]   ;;  %s309_s19 = scalar_lea.hbm %s475_s0, 256 }
   0x3   :  { %s17_s16 = sshll.u32 %s381_s15, 4  ;;  %p310_p0 = scmp.ne.s32.totalorder %s475_s0, %s309_s19  ;;  %s18_s16 = int_to_ptr.vmem [resolvable:$true] %s17_s16 }
   0x4   :  { %p313_p1 = scmp.lt.u32.totalorder %s309_s19, %s475_s0 }
   0x6   :  { %p315_p2 = pnand %p313_p1, %p310_p0 }
   0x8   :  { %318 = shalt.err (!%p315_p2)
}
   0x9   :  { %s319_s24 = scalar_lea.vmem %s18_s16, 256  ;;  %p324_p4 = scmp.lt.s32.totalorder %s18_s16, %s18_s16 }
   0xa   :  { %p320_p3 = scmp.ne.s32.totalorder %s18_s16, %s319_s24  ;;  %p325_p5 = scmp.lt.s32.totalorder %s319_s24, %s319_s24 }
   0xc   :  { %p326_p6 = por %p325_p5, %p324_p4 }
   0xe   :  { %p327_p7 = pnand %p326_p6, %p320_p3 }
  0x10   :  { %330 = shalt.err (!%p327_p7)
}
  0x11   :  { %s382_s25 = smov 128   ;;  %s383_s26 = smov 8  }
  0x12   :  { %23 = dma.hbm_to_vmem [thread:$0]  %s475_s0, 256, %s18_s16, [#allocation3], %s382_s25, %s382_s25, %s383_s26  }
  0x13   :  { %s384_s29 = smov [#allocation5]   ;;  %s331_s7 = scalar_lea.hbm %s477_s2, 512 }
  0x14   :  { %s31_s30 = sshll.u32 %s384_s29, 4  ;;  %p332_p8 = scmp.ne.s32.totalorder %s477_s2, %s331_s7  ;;  %s32_s30 = int_to_ptr.vmem [resolvable:$true] %s31_s30 }
  0x15   :  { %p335_p9 = scmp.lt.u32.totalorder %s331_s7, %s477_s2 }
  0x17   :  { %p337_p10 = pnand %p335_p9, %p332_p8 }
  0x19   :  { %340 = shalt.err (!%p337_p10)
}
  0x1a   :  { %s341_s12 = scalar_lea.vmem %s32_s30, 512  ;;  %p346_p12 = scmp.lt.s32.totalorder %s32_s30, %s32_s30 }
  0x1b   :  { %p342_p11 = scmp.ne.s32.totalorder %s32_s30, %s341_s12  ;;  %p347_p13 = scmp.lt.s32.totalorder %s341_s12, %s341_s12 }
  0x1d   :  { %p348_p0 = por %p347_p13, %p346_p12 }
  0x1f   :  { %p349_p1 = pnand %p348_p0, %p342_p11 }
  0x21   :  { %352 = shalt.err (!%p349_p1)
}
  0x22   :  { %37 = dma.hbm_to_vmem [thread:$0]  %s477_s2, 512, %s32_s30, [#allocation6], %s382_s25, %s382_s25, %s383_s26  }
  0x23   :  { %375 = dma.done.wait [#allocation3], 256  }
  0x24   :  { %376 = vsyncadd [#allocation3], 4294967040 }
  0x25   :  { %377 = dma.done.wait [#allocation6], 512  }
  0x26   :  { %378 = vsyncadd [#allocation6], 4294966784  ;;  %v439_v0 = vld [vmem:[#allocation2] sm:$0xff]  ;;  %vm57_vm0 = vcmask 261120   ;;  %v444_v2 = vld [vmem:[#allocation2 + $0x8] sm:$0xff]  ;;  %v66_v7 = vlaneseq  ;;  %vm76_vm1 = vcmask 1041409  }
  0x27   :  { %v265_v1 = vld [vmem:[%s476_s1] ss:$0 sm:$0xff]  ;;  %vm79_vm2 = vcmask 58368   ;;  %v385_v17 = vmov 0   ;;  %v162_v42 = vld [vmem:[#allocation5] sm:$0xff]  ;;  %v163_v43 = vld [vmem:[#allocation5 + $0x8] sm:$0xff] }
  0x28   :  { %v55_v3 = vmul.f32 %v265_v1, %v439_v0  ;;  %v56_v4 = vmul.f32 %v265_v1, %v444_v2  ;;  %v67_v8 = vand.u32 127, %v66_v7  ;;  %v69_v9 = vshrl.u32 %v66_v7, 7  ;;  %300 = vset.pattern.permute.xlu0 %v385_v17  ;;  %299 = vset.pattern.permute.xlu1 %v385_v17  ;;  %v164_v46 = vld [vmem:[#allocation5 + $0x10] sm:$0xff]  ;;  %v165_v47 = vld [vmem:[#allocation5 + $0x18] sm:$0xff]  ;;  %s389_s16 = smov [#allocation7]  }
  0x29   :  { %v285_v44 = vpack.c.bf16 %v163_v43, %v162_v42  ;;  %v386_v45 = vmov 0.0|0.0   ;;  %v288_v48 = vpack.c.bf16 %v165_v47, %v164_v46  ;;  %vm387_vm3 = vmmov 0   ;;  %s255_s17 = sshll.u32 %s389_s16, 4  ;;  %s256_s17 = int_to_ptr.vmem [resolvable:$true] %s255_s17 }
  0x2a   :  { %v58_v5 = vsel %vm57_vm0, %v55_v3, 0.0  ;;  %v61_v6 = vsel %vm57_vm0, %v56_v4, 0.0  ;;  %v70_v11 = vsub.s32 %v67_v8, %v69_v9  ;;  %v86_v18 = vsub.s32 0, %v69_v9  ;;  %284 = vmatprep.subr.bf16.mxu0 %v386_v45  ;;  %s353_s18 = scalar_lea.vmem %s256_s17, 32  ;;  %p358_p3 = scmp.lt.s32.totalorder %s256_s17, %s256_s17 }
  0x2b   :  { %59 = vadd.xlane.f32.xlu0 %v58_v5  ;;  %v90_v19 = vsub.s32 1, %v69_v9  ;;  %286 = vmatpush3.bf16.msra.mxu0 %v285_v44  ;;  %v388_v49 = vmov 0.0   ;;  %p354_p2 = scmp.ne.s32.totalorder %s256_s17, %s353_s18  ;;  %p359_p4 = scmp.lt.s32.totalorder %s353_s18, %s353_s18 }
  0x2c   :  { %287 = vmatprep.subr.bf16.mxu0 %v386_v45  ;;  %281 = vmatprep.mubr.msk.f32.mxu0 %vm387_vm3, %v388_v49 }
  0x2d   :  { %p360_p5 = por %p359_p4, %p358_p3 }
  0x2f   :  { %62 = vadd.xlane.f32.xlu0 %v61_v6  ;;  %289 = vmatpush3.bf16.msra.mxu0 %v288_v48  ;;  %p361_p6 = pnand %p360_p5, %p354_p2 }
  0xb8   :  { %v60_v10 = vpop.xlane.xlu0 %59 }
  0xb9   :  { %v71_v13 = vrot.slane %v60_v10, %v70_v11 }
  0xbc   :  { %v63_v12 = vpop.xlane.xlu0 %62 }
  0xbd   :  { %v75_v14 = vrot.slane %v63_v12, %v70_v11 }
  0xbf   :  { %v77_v15 = vsel %vm76_vm1, %v75_v14, %v71_v13 }
  0xc0   :  { %v80_v16 = vsel %vm79_vm2, %v77_v15, -inf }
  0xc1   :  { %81 = vmax.xlane.f32.xlu1 %v80_v16 }
 0x14e   :  { %v82_v20 = vpop.xlane.xlu1 %81 }
 0x14f   :  { %v87_v21 = vrot.slane %v82_v20, %v86_v18  ;;  %v91_v22 = vrot.slane %v82_v20, %v90_v19 }
 0x151   :  { %v94_v23 = vsub.f32 %v60_v10, %v87_v21  ;;  %v95_v24 = vsub.f32 %v63_v12, %v91_v22 }
 0x153   :  { %v96_v25 = vmul.f32 1.442695, %v94_v23  ;;  %v98_v26 = vmul.f32 1.442695, %v95_v24 }
 0x155   :  { %301 = vpow2.f32 %v96_v25 }
 0x156   :  { %303 = vpow2.f32 %v98_v26 }
 0x15f   :  { %v302_v27 = vpop.eup %301 }
 0x160   :  { %v304_v28 = vpop.eup %303  ;;  %103 = vperm.xlu1 %299, %v302_v27  }
 0x161   :  { %106 = vperm.xlu0 %300, %v304_v28  }
 0x1df   :  { %v104_v29 = vpop.permute.xlu1 %103 }
 0x1e0   :  { %v107_v30 = vpop.permute.xlu0 %106  ;;  %v111_v31 = vrot.slane %v104_v29, %v70_v11 }
 0x1e1   :  { %v115_v32 = vrot.slane %v107_v30, %v70_v11 }
 0x1e3   :  { %v116_v33 = vsel %vm76_vm1, %v115_v32, %v111_v31 }
 0x1e4   :  { %v118_v34 = vsel %vm79_vm2, %v116_v33, 0.0 }
 0x1e5   :  { %119 = vadd.xlane.f32.xlu1 %v118_v34 }
 0x272   :  { %v120_v35 = vpop.xlane.xlu1 %119 }
 0x273   :  { %v125_v36 = vrot.slane %v120_v35, %v86_v18  ;;  %v129_v37 = vrot.slane %v120_v35, %v90_v19 }
 0x275   :  { %305 = vrcp.f32 %v125_v36 }
 0x276   :  { %307 = vrcp.f32 %v129_v37 }
 0x27f   :  { %v306_v38 = vpop.eup %305 }
 0x280   :  { %v133_v39 = vmul.f32 %v306_v38, %v302_v27  ;;  %v308_v40 = vpop.eup %307 }
 0x281   :  { %v135_v41 = vmul.f32 %v308_v40, %v304_v28 }
 0x282   :  { %138 = vperm.xlu0 %300, %v133_v39  }
 0x286   :  { %143 = vperm.xlu0 %300, %v135_v41  }
 0x301   :  { %v139_v50 = vpop.permute.xlu0 %138 }
 0x302   :  { %v146_v51 = vmul.f32 %v139_v50, %v439_v0 }
 0x304   :  { %v148_v52 = vsel %vm57_vm0, %v146_v51, 0.0 }
 0x305   :  { %v149_v53 = vrot.slane %v148_v52, 4  ;;  %v144_v54 = vpop.permute.xlu0 %143 }
 0x306   :  { %v147_v55 = vmul.f32 %v144_v54, %v444_v2  ;;  %v266_v2 = vld [vmem:[%s478_s3] ss:$0 sm:$0xff] }
 0x307   :  { %v150_v56 = vadd.f32 %v149_v53, %v148_v52 }
 0x308   :  { %v155_v57 = vsel %vm57_vm0, %v147_v55, 0.0 }
 0x309   :  { %v151_v58 = vrot.slane %v150_v56, 2  ;;  %v156_v59 = vrot.slane %v155_v57, 4 }
 0x30b   :  { %v152_v60 = vadd.f32 %v151_v58, %v150_v56  ;;  %v157_v61 = vadd.f32 %v156_v59, %v155_v57 }
 0x30d   :  { %v158_v62 = vrot.slane %v157_v61, 2  ;;  %v153_v63 = vrot.slane %v152_v60, 1 }
 0x30f   :  { %v159_v1 = vadd.f32 %v158_v62, %v157_v61  ;;  %v154_v4 = vadd.f32 %v153_v63, %v152_v60 }
 0x311   :  { %v160_v3 = vrot.slane %v159_v1, 1 }
 0x313   :  { %v161_v5 = vadd.f32 %v160_v3, %v159_v1 }
 0x315   :  { %v175_v0 = vsel %vm76_vm1, %v161_v5, %v154_v4 }
 0x316   :  { %282 = vmatmul.mubr.msk.f32.vlgmr.msra.gmra.mrb[0].mxu0 %vm57_vm0, %v175_v0 }
 0x3e9   :  { %v244_v6 = vpop.f32.mrb[0].mxu0 }
 0x3ea   :  { %v245_v7 = vadd.f32 %v266_v2, %v244_v6  ;;  %v283_v8 = vpop.f32.mrb[1].mxu0 }
 0x3ec   :  { %248 = vst [vmem:[#allocation7] sm:$0x3] %v245_v7 }
 0x3ed   :  { %364 = shalt.err (!%p361_p6)
}
 0x3ee   :  { %s365_s21 = scalar_lea.hbm %s479_s4, 32 }
 0x3ef   :  { %p366_p7 = scmp.ne.s32.totalorder %s479_s4, %s365_s21  ;;  %p369_p8 = scmp.lt.u32.totalorder %s365_s21, %s479_s4 }
 0x3f1   :  { %p371_p9 = pnand %p369_p8, %p366_p7 }
 0x3f3   :  { %374 = shalt.err (!%p371_p9)
}
 0x3f4   :  { %258 = dma.vmem_to_hbm [thread:$0]  %s256_s17, 32, %s479_s4, [#allocation4]  }
 0x3f5   :  { %379 = dma.done.wait [#allocation4], 32  }
 0x3f6   :  { %380 = vsyncadd [#allocation4], 4294967264 }
 0x3f7   :  { %262 = vsyncpa [#allocation3], 1 }
 0x3f8   :  { %263 = vsyncpa [#allocation6], 1 }
 0x3f9   :  { %264 = vsyncpa [#allocation4], 1 }

</bundles_post_ra>
